<compile_context>
chip_gen: v6e
topology: v6e:2x2x1
jax: 0.10.0
libtpu: 0.0.40
codegen_flags: <defaults>
</compile_context>

<pallas_src>
import functools

import jax
import jax.numpy as jnp
from jax.experimental import pallas as pl
from jax.experimental.pallas import tpu as pltpu


# ------------------------------ tiling helpers ------------------------------

def _pick_tile(dim, preferred, align, prefer=()):
    """Largest tile <= preferred that divides dim, trying the alignments in
    `prefer` first (e.g. 256 for the v6e/v7x 256-wide MXU), then `align`;
    falls back to the full dim (block == full array dim is always legal)."""
    if dim <= preferred:
        return dim
    for a in tuple(prefer) + (align,):
        t = (preferred // a) * a
        while t >= a:
            if dim % t == 0:
                return t
            t -= a
    return dim


def _heads_per_group(n_heads, head_dim):
    """Group heads so one group spans >= 128 lanes where possible."""
    hpg = max(1, min(n_heads, 128 // max(head_dim, 1)))
    while n_heads % hpg:
        hpg -= 1
    return max(hpg, 1)


# ------------------------------ Pallas kernels ------------------------------

def _matmul_bias_kernel(x_ref, w_ref, b_ref, o_ref, acc_ref, *, activation):
    """o = act(x @ w + b), tiled over (M, N, K); K is the last grid axis."""
    @pl.when(pl.program_id(2) == 0)
    def _():
        acc_ref[...] = jnp.zeros_like(acc_ref)

    acc_ref[...] += jnp.dot(x_ref[...], w_ref[...],
                            preferred_element_type=jnp.float32)

    @pl.when(pl.program_id(2) == pl.num_programs(2) - 1)
    def _():
        h = acc_ref[...] + b_ref[...].astype(jnp.float32)
        if activation == "gelu":
            # TODO(synk): HF BERT default is exact erf-GELU; tanh approx used
            # here (synthetic weights, no checkpoint to match).
            h = jax.nn.gelu(h, approximate=True)
        o_ref[...] = h.astype(o_ref.dtype)


def _matmul_res_ln_kernel(x_ref, w_ref, b_ref, r_ref, g_ref, bt_ref,
                          o_ref, acc_ref, *, eps):
    """o = LayerNorm(resid + x @ w + b).  N (= hidden) is kept whole so the
    LayerNorm reduction lives entirely in the matmul epilogue."""
    @pl.when(pl.program_id(1) == 0)
    def _():
        acc_ref[...] = jnp.zeros_like(acc_ref)

    acc_ref[...] += jnp.dot(x_ref[...], w_ref[...],
                            preferred_element_type=jnp.float32)

    @pl.when(pl.program_id(1) == pl.num_programs(1) - 1)
    def _():
        h = (acc_ref[...] + b_ref[...].astype(jnp.float32)
             + r_ref[...].astype(jnp.float32))
        mean = jnp.mean(h, axis=-1, keepdims=True)
        var = jnp.mean((h - mean) ** 2, axis=-1, keepdims=True)
        o_ref[...] = ((h - mean) * jax.lax.rsqrt(var + eps)
                      * g_ref[...].astype(jnp.float32)
                      + bt_ref[...].astype(jnp.float32)).astype(o_ref.dtype)


def _embed_add_ln_kernel(w_ref, pt_ref, g_ref, b_ref, o_ref, *, eps):
    """o = LayerNorm(word_emb + (pos_emb + type_emb)) — the embedding adds are
    fused into the LN kernel so the summed embeddings never round-trip HBM."""
    h = w_ref[...].astype(jnp.float32) + pt_ref[...].astype(jnp.float32)
    mean = jnp.mean(h, axis=-1, keepdims=True)
    var = jnp.mean((h - mean) ** 2, axis=-1, keepdims=True)
    o_ref[...] = ((h - mean) * jax.lax.rsqrt(var + eps)
                  * g_ref[...].astype(jnp.float32)
                  + b_ref[...].astype(jnp.float32)).astype(o_ref.dtype)


def _attention_kernel(q_ref, kv_ref, m_ref, o_ref, ctx_ref, *,
                      heads_per_group, head_dim, group_width):
    """One (batch, head-group, query-tile) grid step.

    q_ref : (1, Tq, 3*gw)  query-tile rows of this group's fused [Q|K|V] cols
    kv_ref: (1, S,  3*gw)  full-sequence slab of the same columns (K, V used;
                           constant block index over the query-tile axis, so
                           it is DMA'd once per (batch, group))
    m_ref : (1, 1, S)      additive attention mask
    o_ref : (1, Tq, gw)    lane-dense context output block
    ctx_ref:(Tq, gw) f32   scratch: each head's context is written in place as
                           it is produced (no concatenate, no cross-head live
                           ranges), single cast + store at the end.
    The 1/sqrt(Dh) softmax scale is folded into the Q weights at init time.
    """
    mask = m_ref[0].astype(jnp.float32)                        # (1, S)
    for h in range(heads_per_group):                           # 1-2 heads
        c0, c1 = h * head_dim, (h + 1) * head_dim
        q = q_ref[0, :, c0:c1]                                 # (Tq, Dh)
        k = kv_ref[0, :, group_width + c0:group_width + c1]    # (S, Dh)
        v = kv_ref[0, :, 2 * group_width + c0:2 * group_width + c1]
        # contract last dims directly (no k.T transpose through the XLU)
        s = jax.lax.dot_general(q, k, (((1,), (1,)), ((), ())),
                                preferred_element_type=jnp.float32)  # (Tq, S)
        s = s + mask
        s_max = jnp.max(s, axis=-1, keepdims=True)
        p = jnp.exp(s - s_max)
        p = p * pl.reciprocal(jnp.sum(p, axis=-1, keepdims=True), approx=True)
        ctx_ref[:, c0:c1] = jnp.dot(p.astype(v.dtype), v,
                                    preferred_element_type=jnp.float32)
    o_ref[0] = ctx_ref[...].astype(o_ref.dtype)


# ------------------------------ Pallas wrappers -----------------------------

def linear(x, w, b, activation=None, out_dtype=None):
    """x: (M, K) @ w: (K, N) + b, tiled/pipelined; bf16 MXU, f32 accumulate."""
    M, K = x.shape
    N = w.shape[1]
    out_dtype = out_dtype or x.dtype
    tm = _pick_tile(M, 1024, 16, prefer=(256,))   # large M tile: weights are
    tn = _pick_tile(N, 512, 128, prefer=(256,))   # re-streamed M/tm times
    tk = _pick_tile(K, 512, 128, prefer=(256,))   # 256-aligned for 256^2 MXU
    grid = (M // tm, N // tn, K // tk)
    return pl.pallas_call(
        functools.partial(_matmul_bias_kernel, activation=activation),
        grid=grid,
        in_specs=[pl.BlockSpec((tm, tk), lambda i, j, k: (i, k)),
                  pl.BlockSpec((tk, tn), lambda i, j, k: (k, j)),
                  pl.BlockSpec((1, tn), lambda i, j, k: (0, j))],
        out_specs=pl.BlockSpec((tm, tn), lambda i, j, k: (i, j)),
        out_shape=jax.ShapeDtypeStruct((M, N), out_dtype),
        scratch_shapes=[pltpu.VMEM((tm, tn), jnp.float32)],
        compiler_params=pltpu.CompilerParams(
            dimension_semantics=("parallel", "parallel", "arbitrary")),
    )(x, w, b.reshape(1, -1))


def linear_residual_layernorm(x, w, b, resid, gamma, beta, eps=1e-12,
                              out_dtype=None):
    """o = LayerNorm(resid + x @ w + b); N (hidden) kept whole per tile."""
    M, K = x.shape
    N = w.shape[1]
    out_dtype = out_dtype or resid.dtype
    tm = _pick_tile(M, 512, 16, prefer=(256,))
    tk = _pick_tile(K, 512, 128, prefer=(256,))
    grid = (M // tm, K // tk)
    return pl.pallas_call(
        functools.partial(_matmul_res_ln_kernel, eps=eps),
        grid=grid,
        in_specs=[pl.BlockSpec((tm, tk), lambda i, k: (i, k)),
                  pl.BlockSpec((tk, N), lambda i, k: (k, 0)),
                  pl.BlockSpec((1, N), lambda i, k: (0, 0)),
                  pl.BlockSpec((tm, N), lambda i, k: (i, 0)),
                  pl.BlockSpec((1, N), lambda i, k: (0, 0)),
                  pl.BlockSpec((1, N), lambda i, k: (0, 0))],
        out_specs=pl.BlockSpec((tm, N), lambda i, k: (i, 0)),
        out_shape=jax.ShapeDtypeStruct((M, N), out_dtype),
        scratch_shapes=[pltpu.VMEM((tm, N), jnp.float32)],
        compiler_params=pltpu.CompilerParams(
            dimension_semantics=("parallel", "arbitrary")),
    )(x, w, b.reshape(1, -1), resid, gamma.reshape(1, -1), beta.reshape(1, -1))


def embed_add_layernorm(word, pos_type, gamma, beta, *, batch, seq, eps=1e-12):
    """LayerNorm(word + pos_type) over hidden; word is (B*S, H), pos_type is
    the per-position (S, H) pos+type slab reused for every batch element."""
    M, H = word.shape
    return pl.pallas_call(
        functools.partial(_embed_add_ln_kernel, eps=eps),
        grid=(batch,),
        in_specs=[pl.BlockSpec((seq, H), lambda b: (b, 0)),
                  pl.BlockSpec((seq, H), lambda b: (0, 0)),
                  pl.BlockSpec((1, H), lambda b: (0, 0)),
                  pl.BlockSpec((1, H), lambda b: (0, 0))],
        out_specs=pl.BlockSpec((seq, H), lambda b: (b, 0)),
        out_shape=jax.ShapeDtypeStruct((M, H), word.dtype),
        compiler_params=pltpu.CompilerParams(
            dimension_semantics=("parallel",)),
    )(word, pos_type, gamma.reshape(1, -1), beta.reshape(1, -1))


def mha_attention(qkv, add_mask, *, n_heads, head_dim, heads_per_group):
    """qkv: (B, S, n_groups*3*gw) grouped fused projection (Q scale baked into
    the weights); add_mask: (B, 1, S) additive.  Grid over (batch, head-group,
    query-tile) so every step loads a contiguous, lane-aligned column block and
    the output store is lane-dense.  Returns (B, S, hidden) in the standard
    head-concatenated layout."""
    B, S, _ = qkv.shape
    gw = heads_per_group * head_dim
    n_groups = n_heads // heads_per_group
    hidden = n_heads * head_dim
    tq = _pick_tile(S, 128, 16)                 # query tiling: (Tq, S) scores
    grid = (B, n_groups, S // tq)
    return pl.pallas_call(
        functools.partial(_attention_kernel, heads_per_group=heads_per_group,
                          head_dim=head_dim, group_width=gw),
        grid=grid,
        in_specs=[pl.BlockSpec((1, tq, 3 * gw), lambda b, g, q: (b, q, g)),
                  pl.BlockSpec((1, S, 3 * gw), lambda b, g, q: (b, 0, g)),
                  pl.BlockSpec((1, 1, S), lambda b, g, q: (b, 0, 0))],
        out_specs=pl.BlockSpec((1, tq, gw), lambda b, g, q: (b, q, g)),
        out_shape=jax.ShapeDtypeStruct((B, S, hidden), qkv.dtype),
        scratch_shapes=[pltpu.VMEM((tq, gw), jnp.float32)],
        compiler_params=pltpu.CompilerParams(
            dimension_semantics=("parallel", "parallel", "parallel")),
    )(qkv, qkv, add_mask)


# ------------------------- model params + forward ---------------------------

def _group_qkv(wq, wk, wv, bq, bk, bv, *, n_heads, heads_per_group):
    """Column-permute separate Q/K/V projections into the grouped fused layout
    [Q_g | K_g | V_g] per head-group g.  This is a pure column permutation of
    a standard checkpoint's concatenated QKV weight."""
    hidden = wq.shape[0]
    head_dim = hidden // n_heads
    gw = heads_per_group * head_dim
    n_groups = n_heads // heads_per_group
    w_cols, b_cols = [], []
    for g in range(n_groups):
        sl = slice(g * gw, (g + 1) * gw)
        w_cols += [wq[:, sl], wk[:, sl], wv[:, sl]]
        b_cols += [bq[sl], bk[sl], bv[sl]]
    return jnp.concatenate(w_cols, axis=1), jnp.concatenate(b_cols)


def init_params(key, *, vocab, hidden, n_layers, intermediate, max_pos,
                n_labels, n_heads, param_dtype=jnp.bfloat16):
    head_dim = hidden // n_heads
    hpg = _heads_per_group(n_heads, head_dim)
    scale = 1.0 / float(head_dim) ** 0.5

    keys = iter(jax.random.split(key, 8 + n_layers * 8))

    def init(shape):
        return (0.02 * jax.random.normal(next(keys), shape,
                                         jnp.float32)).astype(param_dtype)

    zeros = lambda n: jnp.zeros((n,), jnp.float32)
    ones = lambda n: jnp.ones((n,), jnp.float32)

    params = {
        "word_emb": init((vocab, hidden)),
        "pos_emb": init((max_pos, hidden)),
        "type_emb": init((2, hidden)),
        "emb_ln_g": ones(hidden), "emb_ln_b": zeros(hidden),
        "layers": [],
        "cls_w": init((hidden, n_labels)),
        "cls_b": zeros(n_labels),
    }
    for _ in range(n_layers):
        wq, wk, wv = (init((hidden, hidden)) for _ in range(3))
        bq, bk, bv = zeros(hidden), zeros(hidden), zeros(hidden)
        # Fold the 1/sqrt(Dh) softmax scale into the Q projection (exact), and
        # pack Q/K/V into the per-head-group fused layout consumed by the
        # attention kernel.
        wq = (wq.astype(jnp.float32) * scale).astype(param_dtype)
        bq = bq * scale
        wqkv, bqkv = _group_qkv(wq, wk, wv, bq, bk, bv,
                                n_heads=n_heads, heads_per_group=hpg)
        params["layers"].append({
            "wqkv": wqkv, "bqkv": bqkv,
            "wo": init((hidden, hidden)), "bo": zeros(hidden),
            "ln1_g": ones(hidden), "ln1_b": zeros(hidden),
            "w1": init((hidden, intermediate)), "b1": zeros(intermediate),
            "w2": init((intermediate, hidden)), "b2": zeros(hidden),
            "ln2_g": ones(hidden), "ln2_b": zeros(hidden),
        })
    return params


def bert_emotion_forward(params, input_ids, attention_mask, *, n_heads):
    B, S = input_ids.shape
    hidden = params["word_emb"].shape[1]
    Dh = hidden // n_heads
    hpg = _heads_per_group(n_heads, Dh)
    act_dtype = params["word_emb"].dtype

    # Embedding gather stays in JAX glue; the (word + pos + type) add and the
    # embedding LayerNorm are fused into one Pallas kernel (single HBM pass).
    word = jnp.take(params["word_emb"], input_ids.reshape(-1),
                    axis=0).astype(act_dtype)                      # (B*S, H)
    # TODO(synk): only token_type 0 is used (single-segment inputs).
    pos_type = (params["pos_emb"][:S].astype(jnp.float32)
                + params["type_emb"][0][None, :].astype(jnp.float32)
                ).astype(act_dtype)                                # (S, H)
    x = embed_add_layernorm(word, pos_type,
                            params["emb_ln_g"], params["emb_ln_b"],
                            batch=B, seq=S)                        # (B*S, H)

    # Additive attention mask: 0 where attended, -1e9 where padded
    add_mask = ((1.0 - attention_mask.astype(jnp.float32))
                * -1e9).reshape(B, 1, S)

    for layer in params["layers"]:
        # Fused QKV projection (single tiled matmul); grouped column layout
        # lets the attention BlockSpec pick lane-aligned per-group blocks.
        qkv = linear(x, layer["wqkv"], layer["bqkv"])              # (B*S, 3H)
        ctx = mha_attention(qkv.reshape(B, S, -1), add_mask,
                            n_heads=n_heads, head_dim=Dh,
                            heads_per_group=hpg)                   # (B, S, H)

        # Output projection fused with residual add + LayerNorm epilogue.
        x = linear_residual_layernorm(ctx.reshape(B * S, hidden),
                                      layer["wo"], layer["bo"], x,
                                      layer["ln1_g"], layer["ln1_b"])

        # FFN: fused bias+GELU matmul, then matmul fused with residual+LN.
        h = linear(x, layer["w1"], layer["b1"], activation="gelu")
        x = linear_residual_layernorm(h, layer["w2"], layer["b2"], x,
                                      layer["ln2_g"], layer["ln2_b"])

    hidden_state = x.reshape(B, S, hidden)
    pooled = hidden_state[:, 0].astype(jnp.float32)    # [CLS] token, (B, H)
    # nn.Dropout is identity in the inference forward.  The classifier head
    # (B x H @ H x n_labels, n_labels << 128) stays in plain JAX: a Pallas
    # call here is pure launch overhead + masked partial stores.
    logits = pooled @ params["cls_w"].astype(jnp.float32) + params["cls_b"]
    return logits


# ----------------------------------- main -----------------------------------

if __name__ == "__main__":
    # Small BERT-like config
    VOCAB, HIDDEN, N_LAYERS, N_HEADS = 100, 32, 2, 2
    INTERMEDIATE, MAX_POS, N_LABELS = 64, 16, 4
    B, S = 2, 8

    key = jax.random.PRNGKey(0)
    k_params, k_ids = jax.random.split(key)

    params = init_params(k_params, vocab=VOCAB, hidden=HIDDEN,
                         n_layers=N_LAYERS, intermediate=INTERMEDIATE,
                         max_pos=MAX_POS, n_labels=N_LABELS, n_heads=N_HEADS)

    input_ids = jax.random.randint(k_ids, (B, S), 0, VOCAB, dtype=jnp.int32)
    attention_mask = jnp.ones((B, S), jnp.int32).at[1, 6:].set(0)  # pad ex. 1

    logits = bert_emotion_forward(params, input_ids, attention_mask,
                                  n_heads=N_HEADS)
    jax.block_until_ready(logits)
    assert logits.shape == (B, N_LABELS) and logits.dtype == jnp.float32
    print("KERNEL_OK")
</pallas_src>

<mosaic_0001>
module attributes {stable_mosaic.version = 11 : i64} {
  func.func @_embed_add_ln_kernel(%arg0: i32, %arg1: memref<8x32xbf16, #tpu.memory_space<vmem>>, %arg2: memref<8x32xbf16, #tpu.memory_space<vmem>>, %arg3: memref<1x32xf32, #tpu.memory_space<vmem>>, %arg4: memref<1x32xf32, #tpu.memory_space<vmem>>, %arg5: memref<8x32xbf16, #tpu.memory_space<vmem>>) attributes {dimension_semantics = [#tpu.dimension_semantics<parallel>], iteration_bounds = array<i64: 2>, scalar_prefetch = 0 : i64, scratch_operands = 0 : i64, tpu.core_type = #tpu.core_type<tc>, window_params = [{transform_indices = @transform_0, window_bounds = array<i64: 8, 32>}, {pipeline_mode = #tpu.pipeline_mode<synchronous>, transform_indices = @transform_1, window_bounds = array<i64: 8, 32>}, {pipeline_mode = #tpu.pipeline_mode<synchronous>, transform_indices = @transform_2, window_bounds = array<i64: 1, 32>}, {pipeline_mode = #tpu.pipeline_mode<synchronous>, transform_indices = @transform_3, window_bounds = array<i64: 1, 32>}, {transform_indices = @transform_4, window_bounds = array<i64: 8, 32>}]} {
    %c0 = arith.constant 0 : index
    %c0_0 = arith.constant 0 : index
    %0 = vector.load %arg1[%c0, %c0_0] : memref<8x32xbf16, #tpu.memory_space<vmem>>, vector<8x32xbf16>
    %1 = arith.extf %0 : vector<8x32xbf16> to vector<8x32xf32>
    %c0_1 = arith.constant 0 : index
    %c0_2 = arith.constant 0 : index
    %2 = vector.load %arg2[%c0_1, %c0_2] : memref<8x32xbf16, #tpu.memory_space<vmem>>, vector<8x32xbf16>
    %3 = arith.extf %2 : vector<8x32xbf16> to vector<8x32xf32>
    %4 = arith.addf %1, %3 : vector<8x32xf32>
    %cst = arith.constant dense<0.000000e+00> : vector<8xf32>
    %5 = vector.multi_reduction <add>, %4, %cst [1] : vector<8x32xf32> to vector<8xf32>
    %6 = vector.shape_cast %5 : vector<8xf32> to vector<8x1xf32>
    %cst_3 = arith.constant 3.200000e+01 : f32
    %7 = vector.broadcast %cst_3 : f32 to vector<8x1xf32>
    %8 = arith.divf %6, %7 : vector<8x1xf32>
    %9 = vector.broadcast %8 : vector<8x1xf32> to vector<8x32xf32>
    %10 = arith.subf %4, %9 : vector<8x32xf32>
    %11 = arith.mulf %10, %10 : vector<8x32xf32>
    %cst_4 = arith.constant dense<0.000000e+00> : vector<8xf32>
    %12 = vector.multi_reduction <add>, %11, %cst_4 [1] : vector<8x32xf32> to vector<8xf32>
    %13 = vector.shape_cast %12 : vector<8xf32> to vector<8x1xf32>
    %cst_5 = arith.constant 3.200000e+01 : f32
    %14 = vector.broadcast %cst_5 : f32 to vector<8x1xf32>
    %15 = arith.divf %13, %14 : vector<8x1xf32>
    %16 = vector.broadcast %8 : vector<8x1xf32> to vector<8x32xf32>
    %17 = arith.subf %4, %16 : vector<8x32xf32>
    %cst_6 = arith.constant 9.99999996E-13 : f32
    %18 = vector.broadcast %cst_6 : f32 to vector<8x1xf32>
    %19 = arith.addf %15, %18 : vector<8x1xf32>
    %20 = math.rsqrt %19 : vector<8x1xf32>
    %21 = vector.broadcast %20 : vector<8x1xf32> to vector<8x32xf32>
    %22 = arith.mulf %17, %21 : vector<8x32xf32>
    %c0_7 = arith.constant 0 : index
    %c0_8 = arith.constant 0 : index
    %23 = vector.load %arg3[%c0_7, %c0_8] : memref<1x32xf32, #tpu.memory_space<vmem>>, vector<1x32xf32>
    %24 = vector.broadcast %23 : vector<1x32xf32> to vector<8x32xf32>
    %25 = arith.mulf %22, %24 : vector<8x32xf32>
    %c0_9 = arith.constant 0 : index
    %c0_10 = arith.constant 0 : index
    %26 = vector.load %arg4[%c0_9, %c0_10] : memref<1x32xf32, #tpu.memory_space<vmem>>, vector<1x32xf32>
    %27 = vector.broadcast %26 : vector<1x32xf32> to vector<8x32xf32>
    %28 = arith.addf %25, %27 : vector<8x32xf32>
    %29 = arith.truncf %28 : vector<8x32xf32> to vector<8x32xbf16>
    %c0_11 = arith.constant 0 : index
    %c0_12 = arith.constant 0 : index
    %30 = vector.load %arg5[%c0_11, %c0_12] : memref<8x32xbf16, #tpu.memory_space<vmem>>, vector<8x32xbf16>
    tpu.vector_store %arg5[%c0_11, %c0_12], %29 {strides = array<i32>} : memref<8x32xbf16, #tpu.memory_space<vmem>>, vector<8x32xbf16>,
    return
  }
  func.func @transform_0(%arg0: i32) -> (i32, i32) {
    %c0_i32 = arith.constant 0 : i32
    %c0_i32_0 = arith.constant 0 : i32
    return %arg0, %c0_i32 : i32, i32
  }
  func.func @transform_1(%arg0: i32) -> (i32, i32) {
    %c0_i32 = arith.constant 0 : i32
    %c0_i32_0 = arith.constant 0 : i32
    %c0_i32_1 = arith.constant 0 : i32
    return %c0_i32, %c0_i32_0 : i32, i32
  }
  func.func @transform_2(%arg0: i32) -> (i32, i32) {
    %c0_i32 = arith.constant 0 : i32
    %c0_i32_0 = arith.constant 0 : i32
    %c0_i32_1 = arith.constant 0 : i32
    return %c0_i32, %c0_i32_0 : i32, i32
  }
  func.func @transform_3(%arg0: i32) -> (i32, i32) {
    %c0_i32 = arith.constant 0 : i32
    %c0_i32_0 = arith.constant 0 : i32
    %c0_i32_1 = arith.constant 0 : i32
    return %c0_i32, %c0_i32_0 : i32, i32
  }
  func.func @transform_4(%arg0: i32) -> (i32, i32) {
    %c0_i32 = arith.constant 0 : i32
    %c0_i32_0 = arith.constant 0 : i32
    return %arg0, %c0_i32 : i32, i32
  }
}

</mosaic_0001>

<bundles_post_ra>
// kernel: tpu_custom_call.1
= control target key start
LH: loop header
LB: loop body
LE: loop exit
PB: predicated region body
PF: predicated region fallthrough
CT: control target
= control target key end

     0   :  { %9 = vsyncpa [#allocation3], 0  ;;  %s762_s0 = inlined_call_operand.hbm [shape: bf16[16,32], index: 0, kind: input, shape index: {}]   ;;  %s763_s1 = inlined_call_operand.hbm [shape: bf16[8,32], index: 1, kind: input, shape index: {}]   ;;  %s764_s2 = inlined_call_operand.vmem [shape: f32[1,32], index: 2, kind: input, shape index: {}]   ;;  %s765_s3 = inlined_call_operand.vmem [shape: f32[1,32], index: 3, kind: input, shape index: {}]   ;;  %s766_s4 = inlined_call_operand.hbm [shape: bf16[16,32], index: 4, kind: output, shape index: {}]  }
   0x1   :  { %11 = vsyncpa [#allocation3 + $0x1], 0 }
   0x2   :  { %12 = vsyncpa [#allocation6], 0 }
   0x3   :  { %13 = vsyncpa [#allocation4], 0 }
   0x4   :  { %15 = vsyncpa [#allocation4 + $0x1], 0  ;;  %s586_s15 = smov 0   ;;  %s588_s16 = smov 0  }
   0x5   :  { %s590_s17 = smov 0   ;;  %s592_s18 = smov 0  }
   0x6 LB: > { %s607_s19 = sadd.s32 4294967295, %s556_s18   ;;  %s359_s20 = sadd.s32 4294967294, %s556_s18   ;;  %s556_s18 = sphi %s592_s18, %s789_s18   ;;  %s552_s17 = sphi %s590_s17, %s788_s17   ;;  %s548_s16 = sphi %s588_s16, %s787_s16   ;;  %s544_s15 = sphi %s586_s15, %s786_s15  }
   0x7   : > { %p41_p0 = scmp.ne.s32.totalorder %s548_s16, %s544_s15  ;;  %p767_p1 = scmp.eq.s32.totalorder %s607_s19, 0 }
   0x8   : > { %p134_p3 = scmp.eq.s32.totalorder %s359_s20, 1  ;;  %p360_p5 = scmp.ge.s32.totalorder %s556_s18, 1 }
   0x9   : > { %p616_p4 = por %p767_p1, %p41_p0  ;;  %p141_p7 = scmp.lt.s32.totalorder %s556_s18, 3 }
   0xa   : > { %p621_p6 = por %p134_p3, %p41_p0  ;;  %s558_s24 = smov [#allocation5]  }
   0xb   : > { %s771_s21 = scalar_select %p616_p4, 1, 0 }
   0xc   : > { %s772_s22 = scalar_select %p621_p6, 1, 0 }
   0xd   : > { %p626_p8 = pnand %p360_p5, %p141_p7  ;;  %s154_s25 = sshll.u32 %s558_s24, 4  ;;  %s155_s25 = int_to_ptr.vmem [resolvable:$true] %s154_s25 }
   0xe   : > { %s634_s26 = sadd.s32 1, %s556_s18   ;;  %s28_s30 = sadd.s32 1, %s552_s17 }
   0xf   : > { %s773_s23 = scalar_select %p626_p8, 1, 0 }
  0x10   : > { %p383_p10 = pneg %p626_p8  ;;  %s25_s28 = ssub.s32 %s556_s18, %s634_s26 }
  0x11   : > { %p644_p12 = scmp.eq.s32.totalorder %s25_s28, 0  ;;  %p35_p13 = scmp.ne.s32.totalorder %s552_s17, %s548_s16 }
  0x12   : > { %p638_p11 = pnand %p383_p10, %p767_p1  ;;  %s445_s5 = scalar_lea.vmem %s155_s25, 64 }
  0x13   : > { %p446_p3 = scmp.ne.s32.totalorder %s155_s25, %s445_s5  ;;  %p453_p9 = scmp.lt.s32.totalorder %s155_s25, %s155_s25 }
  0x14   : > { %p436_p0 = pneg %p638_p11  ;;  %p454_p2 = scmp.lt.s32.totalorder %s445_s5, %s445_s5 }
  0x16   : > { %p448_p5 = pnand %p446_p3, %p436_p0  ;;  %p455_p10 = por %p454_p2, %p453_p9 }
  0x18   : > { %p449_p7 = pneg %p448_p5 }
  0x1a   : > { %p456_p1 = pnand %p455_p10, %p449_p7 }
  0x1c   : > { %459 = shalt.err (!%p456_p1)
}
  0x1d   : > { %386 = dma.hbm_to_vmem [thread:$0]  (!%p638_p11), %s763_s1, 64, %s155_s25, [#allocation6]  }
  0x1e   : > { %s661_s8 = scalar_select %p644_p12, %s552_s17, %s28_s30  }
  0x1f   : > { %p36_p1 = scmp.eq.s32.totalorder %s556_s18, 0  ;;  %p776_p2 = scmp.eq.s32.totalorder %s607_s19, 1 }
  0x20   : > { %p396_p0 = scmp.lt.s32.totalorder %s556_s18, 2  ;;  %s171_s10 = sand.u32 1, %s552_s17  }
  0x21   : > { %p669_p9 = por %p776_p2, %p35_p13  ;;  %p37_p3 = por %p36_p1, %p35_p13 }
  0x22   : > { %s363_s11 = sshll.u32 %s171_s10, 2  ;;  %s364_s12 = sshll.u32 %s556_s18, 6 }
  0x23   : > { %s777_s9 = scalar_select %p669_p9, 1, 0 }
  0x24   : > { %s682_s20 = scalar_lea.hbm %s762_s0, %s364_s12  ;;  %s175_s24 = scalar_lea.vmem [#allocation2], %s363_s11 }
  0x25   : > { %s182_s25 = sshll.u32 %s175_s24, 4  ;;  %p684_p11 = pnand %p396_p0, %p37_p3  ;;  %s183_s25 = int_to_ptr.vmem [resolvable:$true] %s182_s25 }
  0x26   : > { %s172_s28 = scalar_lea.sflag [#allocation3], %s171_s10  ;;  %s460_s29 = scalar_lea.hbm %s682_s20, 64 }
  0x27   : > { %p461_p12 = scmp.ne.s32.totalorder %s682_s20, %s460_s29  ;;  %p462_p13 = pneg %p684_p11 }
  0x28   : > { %s465_s6 = scalar_lea.hbm %s762_s0, 128  ;;  %p466_p10 = scmp.lt.s32.totalorder %s682_s20, %s762_s0 }
  0x29   : > { %p463_p5 = pnand %p462_p13, %p461_p12  ;;  %p467_p1 = scmp.lt.s32.totalorder %s465_s6, %s460_s29 }
  0x2b   : > { %p464_p7 = pneg %p463_p5  ;;  %p468_p2 = por %p467_p1, %p466_p10 }
  0x2d   : > { %p469_p0 = pnand %p468_p2, %p464_p7 }
  0x2f   : > { %472 = shalt.err (!%p469_p0)
}
  0x30   : > { %s473_s12 = scalar_lea.vmem %s183_s25, 64  ;;  %s559_s10 = smov [#allocation2]  }
  0x31   : > { %p474_p3 = scmp.ne.s32.totalorder %s183_s25, %s473_s12  ;;  %s478_s13 = sshll.u32 %s559_s10, 4  ;;  %s479_s13 = int_to_ptr.vmem [resolvable:$false] %s478_s13 }
  0x32   : > { %s480_s14 = scalar_lea.vmem %s479_s13, 128  ;;  %p481_p12 = scmp.lt.s32.totalorder %s183_s25, %s479_s13 }
  0x33   : > { %p476_p6 = pnand %p474_p3, %p462_p13  ;;  %p482_p5 = scmp.lt.s32.totalorder %s480_s14, %s473_s12 }
  0x35   : > { %p477_p9 = pneg %p476_p6  ;;  %p483_p4 = por %p482_p5, %p481_p12 }
  0x37   : > { %p484_p8 = pnand %p483_p4, %p477_p9 }
  0x39   : > { %487 = shalt.err (!%p484_p8)
}
  0x3a   : > { %390 = dma.hbm_to_vmem [thread:$0]  (!%p684_p11), %s682_s20, 64, %s183_s25, %s172_s28  }
  0x3b   : > { %p779_p7 = scmp.ne.s32.totalorder %s773_s23, 0 }
  0x3c   : > { %s705_s24 = sand.u32 (!%p779_p7), 1, %s548_s16   ;;  %p780_p4 = scmp.ne.s32.totalorder (!%p779_p7), %s771_s21, 0 }
  0x3d   : > { %191 = sbr.rel (%p779_p7) target bundleno = 398 (0x18e), region = 36  ;;  %s366_s29 = sshll.u32 (!%p779_p7), %s705_s24, 2 }
  0x3e   : > { %s194_s30 = scalar_lea.sflag (!%p779_p7), [#allocation3], %s705_s24  ;;  %s197_s5 = scalar_lea.vmem (!%p779_p7), [#allocation2], %s366_s29 }
  0x42   : > { %531 = dma.done.wait (%p780_p4), %s194_s30, 64  }
  0x43   : > { %533 = vsyncadd (%p780_p4), %s194_s30, 4294967232  ;;  %p781_p6 = scmp.eq.s32.totalorder %s607_s19, 0 }
  0x45   : > { %535 = dma.done.wait (%p781_p6), [#allocation6], 64   ;;  %p782_p8 = pmov %p781_p6 }
  0x46   : > { %v226_v0 = vld [vmem:[%s197_s5] sm:$0xf]  ;;  %v228_v1 = vld [vmem:[#allocation5] sm:$0xf]  ;;  %vm231_vm0 = vcmask 261120   ;;  %s372_s27 = sshll.u32 %s607_s19, 6 }
  0x47   : > { %537 = vsyncadd (%p782_p8), [#allocation6], 4294967232  ;;  %v227_v2 = vunpack.c.l.bf16 %v226_v0  ;;  %v229_v3 = vunpack.c.l.bf16 %v228_v1  ;;  %v369_v15 = vld [vmem:[%s764_s2] ss:$0 sm:$0xff]  ;;  %s225_s28 = scalar_lea.vmem [#allocation7], %s366_s29  ;;  %vm263_vm1 = vcmask 257024   ;;  %s277_s12 = scalar_lea.hbm %s766_s4, %s372_s27 }
  0x48   : > { %v370_v17 = vld [vmem:[%s765_s3] ss:$0 sm:$0xff]  ;;  %s279_s6 = sshll.u32 %s225_s28, 4  ;;  %s266_s10 = scalar_lea.sflag [#allocation4], %s705_s24  ;;  %s280_s6 = int_to_ptr.vmem [resolvable:$true] %s279_s6 }
  0x49   : > { %v230_v4 = vadd.f32 %v229_v3, %v227_v2  ;;  %s488_s13 = scalar_lea.vmem %s280_s6, 64  ;;  %p783_p11 = scmp.ne.s32.totalorder %s777_s9, 0 }
  0x4a   : > { %p489_p9 = scmp.ne.s32.totalorder %s280_s6, %s488_s13  ;;  %s560_s14 = smov [#allocation7]  }
  0x4b   : > { %v232_v5 = vsel %vm231_vm0, %v230_v4, 0.0  ;;  %s492_s19 = sshll.u32 %s560_s14, 4  ;;  %s493_s19 = int_to_ptr.vmem [resolvable:$false] %s492_s19 }
  0x4c   : > { %233 = vadd.xlane.f32.xlu0 %v232_v5  ;;  %p490_p13 = pnand %p489_p9, %p783_p11  ;;  %s494_s29 = scalar_lea.vmem %s493_s19, 128 }
  0x4d   : > { %p495_p1 = scmp.lt.s32.totalorder %s280_s6, %s493_s19  ;;  %p496_p2 = scmp.lt.s32.totalorder %s494_s29, %s488_s13 }
  0x4e   : > { %p491_p10 = pneg %p490_p13 }
  0x4f   : > { %p497_p0 = por %p496_p2, %p495_p1 }
  0x51   : > { %p498_p3 = pnand %p497_p0, %p491_p10 }
  0xd5   : > { %v234_v6 = vpop.xlane.xlu0 %233 }
  0xd6   : > { %v236_v7 = vmul.f32 0.03125, %v234_v6 }
  0xd8   : > { %v237_v8 = vsub.f32 %v230_v4, %v236_v7 }
  0xda   : > { %v238_v9 = vmul.f32 %v237_v8, %v237_v8 }
  0xdc   : > { %v239_v10 = vsel %vm231_vm0, %v238_v9, 0.0 }
  0xdd   : > { %240 = vadd.xlane.f32.xlu0 %v239_v10 }
 0x166   : > { %v241_v11 = vpop.xlane.xlu0 %240 }
 0x167   : > { %v242_v12 = vmul.f32 0.03125, %v241_v11 }
 0x169   : > { %v243_v13 = vadd.f32 1e-12, %v242_v12 }
 0x16b   : > { %432 = vrsqrt.f32 %v243_v13 }
 0x178   : > { %v433_v14 = vpop.eup %432 }
 0x179   : > { %v245_v16 = vmul.f32 %v433_v14, %v237_v8 }
 0x17b   : > { %v253_v18 = vmul.f32 %v369_v15, %v245_v16 }
 0x17d   : > { %v261_v19 = vadd.f32 %v370_v17, %v253_v18 }
 0x17f   : > { %v262_v20 = vpack.c.bf16 %v261_v19, %v261_v19 }
 0x181   : > { %264 = vst.msk [vmem:[%s225_s28] sm:$0xf] %vm263_vm1, %v262_v20 }
 0x182   : > { %501 = shalt.err (!%p498_p3)
}
 0x183   : > { %s502_s30 = scalar_lea.hbm %s277_s12, 64  ;;  %s506_s21 = scalar_lea.hbm %s766_s4, 128 }
 0x184   : > { %p503_p12 = scmp.ne.s32.totalorder %s277_s12, %s502_s30  ;;  %p507_p4 = scmp.lt.s32.totalorder %s277_s12, %s766_s4 }
 0x185   : > { %p508_p6 = scmp.lt.s32.totalorder %s506_s21, %s502_s30 }
 0x186   : > { %p504_p5 = pnand %p503_p12, %p783_p11 }
 0x187   : > { %p509_p8 = por %p508_p6, %p507_p4 }
 0x188   : > { %p505_p7 = pneg %p504_p5 }
 0x18a   : > { %p510_p9 = pnand %p509_p8, %p505_p7 }
 0x18c   : > { %513 = shalt.err (!%p510_p9)
}
 0x18d   : > { %381 = dma.vmem_to_hbm [thread:$0]  (%p783_p11), %s280_s6, 64, %s277_s12, %s266_s10  }
 0x18e PF: > { %s291_s25 = sand.u32 1, %s544_s15   ;;  %p784_p13 = scmp.ne.s32.totalorder %s772_s22, 0 }
 0x18f   : > { %p785_p10 = scmp.ge.s32.totalorder %s556_s18, 2  ;;  %s292_s27 = scalar_lea.sflag [#allocation4], %s291_s25 }
 0x191   : > { %p392_p1 = pnand %p785_p10, %p784_p13 }
 0x193   : > { %p393_p2 = pneg %p392_p1 }
 0x195   : > { %539 = dma.done.wait (%p393_p2), %s292_s27, 64  }
 0x196   : > { %541 = vsyncadd (%p393_p2), %s292_s27, 4294967232  ;;  %p18_p0 = scmp.ge.s32.totalorder %s634_s26, 4   ;;  %s786_s15 = smov %s548_s16 }
 0x197   : > { %s787_s16 = smov %s552_s17  ;;  %s788_s17 = smov %s661_s8 }
 0x198   : > { %s789_s18 = smov %s634_s26  ;;  %20 = sbr.rel (!%p18_p0) target bundleno = 6 (0x6), region = 85 }
 0x19d   :  { %297 = vsyncpa [#allocation3], 1 }
 0x19e   :  { %299 = vsyncpa [#allocation3 + $0x1], 1 }
 0x19f   :  { %300 = vsyncpa [#allocation6], 1 }
 0x1a0   :  { %301 = vsyncpa [#allocation4], 1 }
 0x1a1   :  { %303 = vsyncpa [#allocation4 + $0x1], 1 }

</bundles_post_ra>
